<compile_context>
chip_gen: v6e
topology: v6e:2x2x1
jax: 0.10.0
libtpu: 0.0.40
codegen_flags: <defaults>
</compile_context>

<pallas_src>
import jax
import jax.numpy as jnp
from jax import lax
from jax.experimental import pallas as pl
from jax.experimental.pallas import tpu as pltpu

LANE = 128
_GROUP = 8          # lane-chunks folded into the accumulators per RMW
_MAX_THW = 4096     # lanes per spatial tile; BW roofline is reached well before this


# --------------------------------------------------------------------------
# Kernel 1: global avg / max pooling over the flattened spatial axis.
# --------------------------------------------------------------------------
def _make_pool_kernel(C, HW, THW, n_k):
    nc_full = THW // LANE                      # chunks in a full tile
    rem = HW - (n_k - 1) * THW                 # valid elements in the last tile
    nc_last_full = rem // LANE                 # full chunks in the last tile
    tail = rem % LANE                          # valid lanes of the partial chunk
    group = _GROUP
    while nc_full % group:                     # group in {8,4,2,1}, divides nc_full
        group //= 2
    inv_hw = 1.0 / float(HW)
    neg_inf = float("-inf")

    def _tree(vals, op):
        vals = list(vals)
        while len(vals) > 1:
            nxt = [op(vals[i], vals[i + 1]) for i in range(0, len(vals) - 1, 2)]
            if len(vals) % 2:
                nxt.append(vals[-1])
            vals = nxt
        return vals[0]

    def kernel(x_ref, avg_ref, max_ref, sum_acc, max_acc):
        # x_ref: (1, C, THW) native dtype.  avg_ref/max_ref: (1, 1, C) f32.
        # sum_acc/max_acc: (1, C, LANE) f32 scratch, live across the k axis.
        k = pl.program_id(1)

        @pl.when(k == 0)
        def _init():
            sum_acc[...] = jnp.zeros_like(sum_acc)
            max_acc[...] = jnp.full_like(max_acc, neg_inf)

        def load(off):
            # Upcast per chunk: HBM traffic stays in the network's native dtype.
            return x_ref[:, :, pl.ds(off, LANE)].astype(jnp.float32)

        def fold_group(chunks):
            # Tree-reduce the group locally, then a single RMW per accumulator.
            sum_acc[...] = sum_acc[...] + _tree(chunks, jnp.add)
            max_acc[...] = jnp.maximum(max_acc[...], _tree(chunks, jnp.maximum))

        if n_k > 1:
            @pl.when(k < n_k - 1)
            def _full_tile():                  # every lane valid: no masking at all
                def body(g, carry):
                    base = g * (group * LANE)
                    fold_group([load(pl.multiple_of(base + u * LANE, LANE))
                                for u in range(group)])
                    return carry
                lax.fori_loop(0, nc_full // group, body, 0, unroll=True)

        @pl.when(k == n_k - 1)
        def _last_tile():
            # Full chunks of the (possibly partial) last tile: static offsets.
            idx = 0
            while idx < nc_last_full:
                cnt = min(group, nc_last_full - idx)
                fold_group([load((idx + u) * LANE) for u in range(cnt)])
                idx += cnt
            if tail:                           # single masked tail chunk (static mask)
                mask = lax.broadcasted_iota(jnp.int32, (1, C, LANE), 2) < tail
                c = load(nc_last_full * LANE)
                sum_acc[...] = sum_acc[...] + jnp.where(mask, c, 0.0)
                max_acc[...] = jnp.maximum(max_acc[...], jnp.where(mask, c, neg_inf))
            # Single cross-lane reduce per batch, then write the pooled rows.
            avg_ref[...] = (jnp.sum(sum_acc[...], axis=-1) * inv_hw).reshape(1, 1, C)
            max_ref[...] = jnp.max(max_acc[...], axis=-1).reshape(1, 1, C)

    return kernel


# --------------------------------------------------------------------------
# Kernel 2: tiny batched MLP epilogue (fc1 -> ReLU6 -> fc2 -> sigmoid).
# --------------------------------------------------------------------------
def _make_mlp_kernel(B, C, Cout):
    def kernel(avg_ref, max_ref, w1_ref, w2_ref, o_ref):
        # avg_ref/max_ref: (B, 1, C) f32.  w1: (C, Cr).  w2: (Cr, Cout).  o: (B, Cout).
        p = jnp.concatenate([avg_ref[...].reshape(B, C),
                             max_ref[...].reshape(B, C)], axis=0)        # (2B, C)
        w1 = w1_ref[...].astype(jnp.float32)
        w2 = w2_ref[...].astype(jnp.float32)
        h = jnp.clip(jnp.dot(p, w1, preferred_element_type=jnp.float32), 0.0, 6.0)
        y = jnp.dot(h, w2, preferred_element_type=jnp.float32)           # (2B, Cout)
        o_ref[...] = jax.nn.sigmoid(y[:B, :] + y[B:, :]).astype(o_ref.dtype)
    return kernel


# --------------------------------------------------------------------------
# Wrapper.
# --------------------------------------------------------------------------
def _vmem_budget_bytes():
    """64 MiB ask on 128-MiB parts (v5e/v6e); 40 MiB on 64-MiB (v7x) parts."""
    try:
        cap = int(pltpu.get_tpu_info().vmem_capacity_bytes)
    except Exception:
        cap = 64 << 20                          # conservative: assume v7x-class VMEM
    return (64 << 20) if cap >= (128 << 20) else (40 << 20)


def _choose_thw(C, HW, itemsize, budget):
    """Largest HW tile whose double-buffered input fits comfortably in the budget."""
    hw_lane = -(-HW // LANE) * LANE
    fixed = 2 * C * LANE * 4                    # f32 scratch accumulators
    usable = max(budget // 2 - fixed, 2 * C * LANE * itemsize)
    max_thw = max(LANE, usable // (2 * C * itemsize))   # 2x = double buffering
    thw = min(hw_lane, max_thw, _MAX_THW)
    if thw >= _GROUP * LANE:                    # keep full tiles a multiple of a group
        return (thw // (_GROUP * LANE)) * (_GROUP * LANE)
    return max(LANE, (thw // LANE) * LANE)


@jax.jit
def sce_forward(x_nchw, w1, w2):
    """x_nchw: (B, C, H, W); w1: (C, Cr); w2: (Cr, Cout) -> (B, Cout, 1, 1)."""
    B, C, H, W = x_nchw.shape
    HW = H * W
    Cout = w2.shape[1]
    itemsize = jnp.dtype(x_nchw.dtype).itemsize

    budget = _vmem_budget_bytes()
    THW = _choose_thw(C, HW, itemsize, budget)
    n_k = -(-HW // THW)

    # Native dtype, no fp32 cast, no spatial padding: reshape is layout-free under jit.
    x_flat = x_nchw.reshape(B, C, HW)

    cost = pl.CostEstimate(
        flops=2 * B * C * HW,
        transcendentals=0,
        bytes_accessed=B * C * HW * itemsize + 2 * B * C * 4,
    )

    # TODO(synk): small-HW / B==1 regimes - block several batches per grid step and/or
    # split the HW reduction over a leading parallel axis so both v7x cores get work.
    avg, mx = pl.pallas_call(
        _make_pool_kernel(C, HW, THW, n_k),
        out_shape=(jax.ShapeDtypeStruct((B, 1, C), jnp.float32),
                   jax.ShapeDtypeStruct((B, 1, C), jnp.float32)),
        grid_spec=pltpu.PrefetchScalarGridSpec(
            num_scalar_prefetch=0,
            grid=(B, n_k),                       # reduction (HW) axis innermost
            in_specs=[pl.BlockSpec((1, C, THW), lambda b, k: (b, 0, k))],
            out_specs=[pl.BlockSpec((1, 1, C), lambda b, k: (b, 0, 0)),
                       pl.BlockSpec((1, 1, C), lambda b, k: (b, 0, 0))],
            scratch_shapes=[pltpu.VMEM((1, C, LANE), jnp.float32),   # running sum
                            pltpu.VMEM((1, C, LANE), jnp.float32)],  # running max
        ),
        compiler_params=pltpu.CompilerParams(
            dimension_semantics=("parallel", "arbitrary"),
            vmem_limit_bytes=budget,
        ),
        cost_estimate=cost,
    )(x_flat)

    # Tiny batched epilogue: one fused (2B,C)@(C,Cr)@(Cr,Cout) MLP + sigmoid.
    out = pl.pallas_call(
        _make_mlp_kernel(B, C, Cout),
        out_shape=jax.ShapeDtypeStruct((B, Cout), x_nchw.dtype),
    )(avg, mx, w1, w2)

    return out.reshape(B, Cout, 1, 1)


# --------------------------------------------------------------------------
# Parameters and pure-JAX reference.
# --------------------------------------------------------------------------
def make_sce_params(key, in_channels, out_channels=None, ratio=16):
    """Deterministic 'normal' (std=0.02) init matching SCE.init_weights('normal')."""
    if in_channels < ratio:
        ratio = in_channels
    reduced = in_channels // ratio
    if out_channels is None:
        out_channels = in_channels
    k1, k2 = jax.random.split(key)
    w1_conv = 0.02 * jax.random.normal(k1, (reduced, in_channels, 1, 1), jnp.float32)
    w2_conv = 0.02 * jax.random.normal(k2, (out_channels, reduced, 1, 1), jnp.float32)
    w1 = jnp.transpose(w1_conv[:, :, 0, 0], (1, 0))  # (C, Cr)
    w2 = jnp.transpose(w2_conv[:, :, 0, 0], (1, 0))  # (Cr, Cout)
    return w1, w2


def sce_reference(x_nchw, w1, w2):
    B, C, H, W = x_nchw.shape
    x_flat = x_nchw.reshape(B, C, H * W).astype(jnp.float32)
    avg_pool = jnp.mean(x_flat, axis=-1)
    max_pool = jnp.max(x_flat, axis=-1)

    def branch(p):
        h = jnp.clip(p @ w1, 0.0, 6.0)
        return h @ w2

    out = jax.nn.sigmoid(branch(avg_pool) + branch(max_pool))
    return out.reshape(B, -1, 1, 1)


if __name__ == "__main__":
    key = jax.random.PRNGKey(0)
    kx, kp = jax.random.split(key)

    B, C, H, W = 2, 4, 16, 16
    x = jax.random.normal(kx, (B, C, H, W), jnp.float32)
    w1, w2 = make_sce_params(kp, in_channels=C, out_channels=None, ratio=16)

    out = jax.block_until_ready(sce_forward(x, w1, w2))
    ref = sce_reference(x, w1, w2)

    assert out.shape == (B, C, 1, 1), out.shape
    assert jnp.allclose(out, ref, atol=1e-5, rtol=1e-5), (out, ref)

    print("KERNEL_OK")
</pallas_src>

<mosaic_0001>
module attributes {stable_mosaic.version = 11 : i64} {
  func.func @kernel(%arg0: memref<2x1x4xf32, #tpu.memory_space<vmem>>, %arg1: memref<2x1x4xf32, #tpu.memory_space<vmem>>, %arg2: memref<4x1xf32, #tpu.memory_space<vmem>>, %arg3: memref<1x4xf32, #tpu.memory_space<vmem>>, %arg4: memref<2x4xf32, #tpu.memory_space<vmem>>) attributes {dimension_semantics = [], scalar_prefetch = 0 : i64, scratch_operands = 0 : i64, tpu.core_type = #tpu.core_type<tc>} {
    %c0 = arith.constant 0 : index
    %c0_0 = arith.constant 0 : index
    %c0_1 = arith.constant 0 : index
    %0 = vector.load %arg0[%c0, %c0_0, %c0_1] : memref<2x1x4xf32, #tpu.memory_space<vmem>>, vector<2x1x4xf32>
    %1 = vector.shape_cast %0 : vector<2x1x4xf32> to vector<2x4xf32>
    %c0_2 = arith.constant 0 : index
    %c0_3 = arith.constant 0 : index
    %c0_4 = arith.constant 0 : index
    %2 = vector.load %arg1[%c0_2, %c0_3, %c0_4] : memref<2x1x4xf32, #tpu.memory_space<vmem>>, vector<2x1x4xf32>
    %3 = vector.shape_cast %2 : vector<2x1x4xf32> to vector<2x4xf32>
    %4 = tpu.concatenate %1, %3 in 0 : vector<2x4xf32>, vector<2x4xf32> -> vector<4x4xf32>
    %c0_5 = arith.constant 0 : index
    %c0_6 = arith.constant 0 : index
    %5 = vector.load %arg2[%c0_5, %c0_6] : memref<4x1xf32, #tpu.memory_space<vmem>>, vector<4x1xf32>
    %c0_7 = arith.constant 0 : index
    %c0_8 = arith.constant 0 : index
    %6 = vector.load %arg3[%c0_7, %c0_8] : memref<1x4xf32, #tpu.memory_space<vmem>>, vector<1x4xf32>
    %cst = arith.constant dense<0.000000e+00> : vector<4x1xf32>
    %7 = tpu.matmul %4, %5, %cst {dimension_numbers = #tpu.dot_dimension_numbers<[1], [0], [0], [1], [0, 0, 1, 1], [], []>} : vector<4x4xf32>, vector<4x1xf32>, vector<4x1xf32> -> vector<4x1xf32>
    %cst_9 = arith.constant 0.000000e+00 : f32
    %cst_10 = arith.constant 6.000000e+00 : f32
    %8 = vector.broadcast %cst_9 : f32 to vector<4x1xf32>
    %9 = arith.maximumf %8, %7 : vector<4x1xf32>
    %10 = vector.broadcast %cst_10 : f32 to vector<4x1xf32>
    %11 = arith.minimumf %10, %9 : vector<4x1xf32>
    %cst_11 = arith.constant dense<0.000000e+00> : vector<4x4xf32>
    %12 = tpu.matmul %11, %6, %cst_11 {dimension_numbers = #tpu.dot_dimension_numbers<[1], [0], [0], [1], [0, 0, 1, 1], [], []>} : vector<4x1xf32>, vector<1x4xf32>, vector<4x4xf32> -> vector<4x4xf32>
    %13 = vector.extract_strided_slice %12 {offsets = [0, 0], sizes = [2, 4], strides = [1, 1]} : vector<4x4xf32> to vector<2x4xf32>
    %14 = vector.extract_strided_slice %12 {offsets = [2, 0], sizes = [2, 4], strides = [1, 1]} : vector<4x4xf32> to vector<2x4xf32>
    %15 = arith.addf %13, %14 : vector<2x4xf32>
    %16 = arith.negf %15 : vector<2x4xf32>
    %17 = math.exp %16 : vector<2x4xf32>
    %cst_12 = arith.constant 1.000000e+00 : f32
    %18 = vector.broadcast %cst_12 : f32 to vector<2x4xf32>
    %19 = arith.addf %18, %17 : vector<2x4xf32>
    %20 = arith.divf %18, %19 : vector<2x4xf32>
    %c0_13 = arith.constant 0 : index
    %c0_14 = arith.constant 0 : index
    %21 = vector.load %arg4[%c0_13, %c0_14] : memref<2x4xf32, #tpu.memory_space<vmem>>, vector<2x4xf32>
    tpu.vector_store %arg4[%c0_13, %c0_14], %20 {strides = array<i32>} : memref<2x4xf32, #tpu.memory_space<vmem>>, vector<2x4xf32>,
    return
  }
}

module attributes {stable_mosaic.version = 11 : i64} {
  func.func @kernel(%arg0: i32, %arg1: i32, %arg2: memref<1x4x256xf32, #tpu.memory_space<vmem>>, %arg3: memref<1x1x4xf32, #tpu.memory_space<vmem>>, %arg4: memref<1x1x4xf32, #tpu.memory_space<vmem>>, %arg5: memref<1x4x128xf32, #tpu.memory_space<vmem>>, %arg6: memref<1x4x128xf32, #tpu.memory_space<vmem>>) attributes {dimension_semantics = [#tpu.dimension_semantics<parallel>, #tpu.dimension_semantics<arbitrary>], iteration_bounds = array<i64: 2, 1>, scalar_prefetch = 0 : i64, scratch_operands = 2 : i64, tpu.core_type = #tpu.core_type<tc>, window_params = [{transform_indices = @transform_0, window_bounds = array<i64: 1, 4, 256>}, {transform_indices = @transform_1, window_bounds = array<i64: 1, 1, 4>}, {transform_indices = @transform_2, window_bounds = array<i64: 1, 1, 4>}]} {
    %c0_i32 = arith.constant 0 : i32
    %0 = arith.cmpi eq, %arg1, %c0_i32 : i32
    %1 = arith.extui %0 : i1 to i32
    %c0_i32_0 = arith.constant 0 : i32
    %2 = arith.cmpi ne, %1, %c0_i32_0 : i32
    scf.if %2 {
      %cst = arith.constant 0.000000e+00 : f32
      %6 = vector.broadcast %cst : f32 to vector<1x4x128xf32>
      %c0 = arith.constant 0 : index
      %c0_3 = arith.constant 0 : index
      %c0_4 = arith.constant 0 : index
      %7 = vector.load %arg5[%c0, %c0_3, %c0_4] : memref<1x4x128xf32, #tpu.memory_space<vmem>>, vector<1x4x128xf32>
      tpu.vector_store %arg5[%c0, %c0_3, %c0_4], %6 {strides = array<i32>} : memref<1x4x128xf32, #tpu.memory_space<vmem>>, vector<1x4x128xf32>,
      %cst_5 = arith.constant 0xFF800000 : f32
      %8 = vector.broadcast %cst_5 : f32 to vector<1x4x128xf32>
      %c0_6 = arith.constant 0 : index
      %c0_7 = arith.constant 0 : index
      %c0_8 = arith.constant 0 : index
      %9 = vector.load %arg6[%c0_6, %c0_7, %c0_8] : memref<1x4x128xf32, #tpu.memory_space<vmem>>, vector<1x4x128xf32>
      tpu.vector_store %arg6[%c0_6, %c0_7, %c0_8], %8 {strides = array<i32>} : memref<1x4x128xf32, #tpu.memory_space<vmem>>, vector<1x4x128xf32>,
    } else {
    }
    %c0_i32_1 = arith.constant 0 : i32
    %3 = arith.cmpi eq, %arg1, %c0_i32_1 : i32
    %4 = arith.extui %3 : i1 to i32
    %c0_i32_2 = arith.constant 0 : i32
    %5 = arith.cmpi ne, %4, %c0_i32_2 : i32
    scf.if %5 {
      %c0 = arith.constant 0 : index
      %c0_3 = arith.constant 0 : index
      %c0_4 = arith.constant 0 : index
      %6 = vector.load %arg2[%c0, %c0_3, %c0_4] : memref<1x4x256xf32, #tpu.memory_space<vmem>>, vector<1x4x128xf32>
      %c0_5 = arith.constant 0 : index
      %c0_6 = arith.constant 0 : index
      %c128 = arith.constant 128 : index
      %7 = vector.load %arg2[%c0_5, %c0_6, %c128] : memref<1x4x256xf32, #tpu.memory_space<vmem>>, vector<1x4x128xf32>
      %c0_7 = arith.constant 0 : index
      %c0_8 = arith.constant 0 : index
      %c0_9 = arith.constant 0 : index
      %8 = vector.load %arg5[%c0_7, %c0_8, %c0_9] : memref<1x4x128xf32, #tpu.memory_space<vmem>>, vector<1x4x128xf32>
      %9 = arith.addf %6, %7 : vector<1x4x128xf32>
      %10 = arith.addf %8, %9 : vector<1x4x128xf32>
      %c0_10 = arith.constant 0 : index
      %c0_11 = arith.constant 0 : index
      %c0_12 = arith.constant 0 : index
      %11 = vector.load %arg5[%c0_10, %c0_11, %c0_12] : memref<1x4x128xf32, #tpu.memory_space<vmem>>, vector<1x4x128xf32>
      tpu.vector_store %arg5[%c0_10, %c0_11, %c0_12], %10 {strides = array<i32>} : memref<1x4x128xf32, #tpu.memory_space<vmem>>, vector<1x4x128xf32>,
      %c0_13 = arith.constant 0 : index
      %c0_14 = arith.constant 0 : index
      %c0_15 = arith.constant 0 : index
      %12 = vector.load %arg6[%c0_13, %c0_14, %c0_15] : memref<1x4x128xf32, #tpu.memory_space<vmem>>, vector<1x4x128xf32>
      %13 = arith.maximumf %6, %7 : vector<1x4x128xf32>
      %14 = arith.maximumf %12, %13 : vector<1x4x128xf32>
      %c0_16 = arith.constant 0 : index
      %c0_17 = arith.constant 0 : index
      %c0_18 = arith.constant 0 : index
      %15 = vector.load %arg6[%c0_16, %c0_17, %c0_18] : memref<1x4x128xf32, #tpu.memory_space<vmem>>, vector<1x4x128xf32>
      tpu.vector_store %arg6[%c0_16, %c0_17, %c0_18], %14 {strides = array<i32>} : memref<1x4x128xf32, #tpu.memory_space<vmem>>, vector<1x4x128xf32>,
      %c0_19 = arith.constant 0 : index
      %c0_20 = arith.constant 0 : index
      %c0_21 = arith.constant 0 : index
      %16 = vector.load %arg5[%c0_19, %c0_20, %c0_21] : memref<1x4x128xf32, #tpu.memory_space<vmem>>, vector<1x4x128xf32>
      %cst = arith.constant dense<0.000000e+00> : vector<1x4xf32>
      %17 = vector.multi_reduction <add>, %16, %cst [2] : vector<1x4x128xf32> to vector<1x4xf32>
      %cst_22 = arith.constant 3.906250e-03 : f32
      %18 = vector.broadcast %cst_22 : f32 to vector<1x4xf32>
      %19 = arith.mulf %17, %18 : vector<1x4xf32>
      %20 = vector.shape_cast %19 : vector<1x4xf32> to vector<1x1x4xf32>
      %c0_23 = arith.constant 0 : index
      %c0_24 = arith.constant 0 : index
      %c0_25 = arith.constant 0 : index
      %21 = vector.load %arg3[%c0_23, %c0_24, %c0_25] : memref<1x1x4xf32, #tpu.memory_space<vmem>>, vector<1x1x4xf32>
      tpu.vector_store %arg3[%c0_23, %c0_24, %c0_25], %20 {strides = array<i32>} : memref<1x1x4xf32, #tpu.memory_space<vmem>>, vector<1x1x4xf32>,
      %c0_26 = arith.constant 0 : index
      %c0_27 = arith.constant 0 : index
      %c0_28 = arith.constant 0 : index
      %22 = vector.load %arg6[%c0_26, %c0_27, %c0_28] : memref<1x4x128xf32, #tpu.memory_space<vmem>>, vector<1x4x128xf32>
      %cst_29 = arith.constant dense<0xFF800000> : vector<1x4xf32>
      %23 = vector.multi_reduction <maximumf>, %22, %cst_29 [2] : vector<1x4x128xf32> to vector<1x4xf32>
      %24 = vector.shape_cast %23 : vector<1x4xf32> to vector<1x1x4xf32>
      %c0_30 = arith.constant 0 : index
      %c0_31 = arith.constant 0 : index
      %c0_32 = arith.constant 0 : index
      %25 = vector.load %arg4[%c0_30, %c0_31, %c0_32] : memref<1x1x4xf32, #tpu.memory_space<vmem>>, vector<1x1x4xf32>
      tpu.vector_store %arg4[%c0_30, %c0_31, %c0_32], %24 {strides = array<i32>} : memref<1x1x4xf32, #tpu.memory_space<vmem>>, vector<1x1x4xf32>,
    } else {
    }
    return
  }
  func.func @transform_0(%arg0: i32, %arg1: i32) -> (i32, i32, i32) {
    %c0_i32 = arith.constant 0 : i32
    %c0_i32_0 = arith.constant 0 : i32
    return %arg0, %c0_i32, %arg1 : i32, i32, i32
  }
  func.func @transform_1(%arg0: i32, %arg1: i32) -> (i32, i32, i32) {
    %c0_i32 = arith.constant 0 : i32
    %c0_i32_0 = arith.constant 0 : i32
    %c0_i32_1 = arith.constant 0 : i32
    return %arg0, %c0_i32, %c0_i32_0 : i32, i32, i32
  }
  func.func @transform_2(%arg0: i32, %arg1: i32) -> (i32, i32, i32) {
    %c0_i32 = arith.constant 0 : i32
    %c0_i32_0 = arith.constant 0 : i32
    %c0_i32_1 = arith.constant 0 : i32
    return %arg0, %c0_i32, %c0_i32_0 : i32, i32, i32
  }
}

</mosaic_0001>

<bundles_post_ra>
// kernel: sce_forward.2
= control target key start
LH: loop header
LB: loop body
LE: loop exit
PB: predicated region body
PF: predicated region fallthrough
CT: control target
= control target key end

     0   :  { %s383_s9 = smov 0   ;;  %s385_s10 = smov 0   ;;  %s424_s0 = inlined_call_operand.vmem [shape: f32[2,4,256], index: 0, kind: input, shape index: {}]   ;;  %s425_s1 = inlined_call_operand.vmem [shape: f32[2,1,4], index: 1, kind: output, shape index: {0}]   ;;  %s426_s2 = inlined_call_operand.vmem [shape: f32[2,1,4], index: 2, kind: output, shape index: {1}]  }
   0x1   :  { %s387_s11 = smov 0  }
   0x2 LB: > { %s25_s12 = sadd.s32 1, %s360_s10  ;;  %p310_p0 = scmp.ge.s32.totalorder %s364_s11, 1  ;;  %s364_s11 = sphi %s387_s11, %s13_s11   ;;  %s360_s10 = sphi %s385_s10, %s428_s10   ;;  %s356_s9 = sphi %s383_s9, %s427_s9  }
   0x3   : > { %p27_p1 = scmp.ge.s32.totalorder %s25_s12, 2  ;;  %p134_p2 = scmp.lt.s32.totalorder %s364_s11, 3 }
   0x5   : > { %s430_s12 = smov (%p27_p1, %s25_s12), 0  ;;  %p135_p3 = pnand %p310_p0, %p134_p2 }
   0x6   : > { %p162_p4 = scmp.lt.s32.totalorder (!%p135_p3), %s356_s9, 1 }
   0x7   : > { %138 = sbr.rel (%p135_p3) target bundleno = 177 (0xb1), region = 24 }
   0xc   : > { %v366_v0 = vmov 0.0   ;;  %v367_v1 = vmov -inf   ;;  %s432_s9 = smov (!%p162_p4, %s356_s9), 1  ;;  %vm194_vm0 = vcmask 1043456   ;;  %v200_v14 = vlaneseq }
   0xd   : > { %181 = vst [vmem:[#allocation2] sm:$0xf] %v366_v0  ;;  %182 = vst [vmem:[#allocation3] sm:$0xf] %v367_v1  ;;  %s315_s13 = sshll.u32 %s432_s9, 3  ;;  %s173_s19 = scalar_lea.vmem %s425_s1, %s432_s9  ;;  %vm207_vm1 = vcmask 24576  }
   0xe   : > { %s169_s16 = scalar_lea.vmem %s424_s0, %s315_s13  ;;  %v201_v15 = vand.u32 127, %v200_v14  ;;  %v203_v16 = vshrl.u32 %v200_v14, 7  ;;  %s176_s22 = scalar_lea.vmem %s426_s2, %s432_s9 }
   0xf   : > { %v183_v2 = vld [vmem:[%s169_s16] sm:$0xf]  ;;  %v184_v3 = vld [vmem:[%s169_s16 + $0x4] sm:$0xf] }
  0x10   : > { %v186_v4 = vadd.f32 %v184_v3, %v183_v2  ;;  %v190_v5 = vmax.f32 %v183_v2, %v184_v3  ;;  %v204_v17 = vsub.s32 %v201_v15, %v203_v16 }
  0x14   : > { %v185_v6 = vld [vmem:[#allocation2] sm:$0xf]  ;;  %v189_v7 = vld [vmem:[#allocation3] sm:$0xf] }
  0x15   : > { %v187_v8 = vadd.f32 %v186_v4, %v185_v6  ;;  %v191_v9 = vmax.f32 %v189_v7, %v190_v5 }
  0x17   : > { %188 = vst [vmem:[#allocation2] sm:$0xf] %v187_v8  ;;  %192 = vst [vmem:[#allocation3] sm:$0xf] %v191_v9 }
  0x1e   : > { %v193_v10 = vld [vmem:[#allocation2] sm:$0xf]  ;;  %v209_v11 = vld [vmem:[#allocation3] sm:$0xf] }
  0x1f   : > { %v195_v12 = vsel %vm194_vm0, %v193_v10, 0.0  ;;  %v210_v13 = vsel %vm194_vm0, %v209_v11, -inf }
  0x20   : > { %196 = vadd.xlane.f32.xlu0 %v195_v12 }
  0x24   : > { %211 = vmax.xlane.f32.xlu0 %v210_v13 }
  0xa9   : > { %v197_v18 = vpop.xlane.xlu0 %196 }
  0xaa   : > { %v198_v19 = vmul.f32 0.00390625, %v197_v18 }
  0xac   : > { %v205_v20 = vrot.slane %v198_v19, %v204_v17 }
  0xad   : > { %v212_v21 = vpop.xlane.xlu0 %211 }
  0xae   : > { %208 = vst.msk [vmem:[%s173_s19] sm:$0x1] %vm207_vm1, %v205_v20  ;;  %v217_v22 = vrot.slane %v212_v21, %v204_v17 }
  0xb0   : > { %219 = vst.msk [vmem:[%s176_s22] sm:$0x1] %vm207_vm1, %v217_v22 }
  0xb1 PF: > { %s13_s11 = sadd.s32 1, %s364_s11   ;;  %s427_s9 = smov %s360_s10 }
  0xb2   : > { %p10_p5 = scmp.ge.s32.totalorder %s13_s11, 4   ;;  %s428_s10 = smov %s430_s12 }
  0xb4   :  { %12 = sbr.rel (!%p10_p5) target bundleno = 2 (0x2), region = 70 }

// kernel: sce_forward.3
= control target key start
LH: loop header
LB: loop body
LE: loop exit
PB: predicated region body
PF: predicated region fallthrough
CT: control target
= control target key end

     0   :  { %vm67_vm0 = vcmask 1043456   ;;  %v28_v1 = vlaneseq  ;;  %v296_v2 = vmov 0.0   ;;  %vm297_vm1 = vmmov 0   ;;  %s346_s0 = inlined_call_operand.vmem [shape: f32[2,1,4], index: 0, kind: input, shape index: {}]   ;;  %s347_s1 = inlined_call_operand.vmem [shape: f32[2,1,4], index: 1, kind: input, shape index: {}]   ;;  %s348_s2 = inlined_call_operand.vmem [shape: f32[4,1], index: 2, kind: input, shape index: {}]   ;;  %s349_s3 = inlined_call_operand.vmem [shape: f32[1,4], index: 3, kind: input, shape index: {}]   ;;  %s350_s4 = inlined_call_operand.hbm [shape: f32[2,4], index: 4, kind: output, shape index: {}]  }
   0x1   :  { %v61_v0 = vld [vmem:[%s348_s2] sm:$0xf]  ;;  %256 = vmatprep.subr.mxu0 %v296_v2  ;;  %258 = vmatprep.mubr.msk.f32.mxu0 %vm297_vm1, %v296_v2  ;;  %v298_v7 = vmov 1966171168  }
   0x2   :  { %v18_v3 = vld [vmem:[%s346_s0] sm:$0x1]  ;;  %v19_v4 = vld [vmem:[%s346_s0 + $0x1] sm:$0x1]  ;;  %257 = vmatpush3.msk.msra.mxu0 %vm67_vm0, %v61_v0  ;;  %261 = vmatprep.subr.mxu1 %v296_v2  ;;  %v26_v8 = vunpack.c.l.s4 %v298_v7  ;;  %v29_v9 = vshrl.u32 %v28_v1, 7 }
   0x3   :  { %v20_v5 = vld [vmem:[%s347_s1] sm:$0x1]  ;;  %v21_v6 = vld [vmem:[%s347_s1 + $0x1] sm:$0x1]  ;;  %263 = vmatprep.mubr.msk.f32.mxu1 %vm297_vm1, %v296_v2 }
   0x4   :  { %9 = vsyncpa [#allocation3], 0  ;;  %v24_v10 = vcombine.low %v18_v3, %v19_v4  ;;  %v27_v11 = vunpack.c.0.s8 %v26_v8  ;;  %v42_v12 = vcombine.low %v20_v5, %v21_v6  ;;  %vm59_vm2 = vcmask 1041408   ;;  %v62_v20 = vld [vmem:[%s349_s3] sm:$0x1]  ;;  %s299_s24 = smov [#allocation2]  }
   0x5   :  { %vm63_vm3 = vcmask 31744   ;;  %vm147_vm4 = vcmask 1040384   ;;  %vm143_vm5 = vcmask 7168   ;;  %s239_s25 = sshll.u32 %s299_s24, 4  ;;  %vm231_vm6 = vcmask 25600   ;;  %s240_s25 = int_to_ptr.vmem [resolvable:$true] %s239_s25 }
   0x6   :  { %v30_v13 = vsub.s32 %v27_v11, %v29_v9  ;;  %262 = vmatpush3.msk.msra.mxu1 %vm147_vm4, %v62_v20  ;;  %s274_s3 = scalar_lea.vmem %s240_s25, 32  ;;  %p279_p1 = scmp.lt.s32.totalorder %s240_s25, %s240_s25 }
   0x7   :  { %p275_p0 = scmp.ne.s32.totalorder %s240_s25, %s274_s3  ;;  %p280_p2 = scmp.lt.s32.totalorder %s274_s3, %s274_s3 }
   0x8   :  { %v31_v14 = vrot.slane %v24_v10, %v30_v13  ;;  %v49_v15 = vrot.slane %v42_v12, %v30_v13 }
   0x9   :  { %p281_p3 = por %p280_p2, %p279_p1 }
   0xa   :  { %v38_v16 = vrot.slane %v31_v14, %v30_v13  ;;  %v50_v17 = vcombine.low %v49_v15, %v49_v15 }
   0xb   :  { %p282_p4 = pnand %p281_p3, %p275_p0 }
   0xc   :  { %v57_v18 = vrot.slane %v50_v17, %v30_v13 }
   0xe   :  { %v60_v19 = vsel %vm59_vm2, %v38_v16, %v57_v18 }
   0xf   :  { %259 = vmatmul.mubr.msk.f32.vlgmr.msra.gmra.mxu0 %vm63_vm3, %v60_v19 }
  0xcf   :  { %v137_v21 = vpop.f32.mrf.mxu0 }
  0xd0   :  { %v141_v22 = vmax.f32 %v137_v21, 0.0 }
  0xd1   :  { %v260_v23 = vpop.f32.mrf.mxu0 }
  0xd2   :  { %v142_v24 = vmin.f32 %v141_v22, 6.0 }
  0xd4   :  { %264 = vmatmul.mubr.msk.f32.vlgmr.msra.gmra.mxu1 %vm143_vm5, %v142_v24 }
 0x194   :  { %v217_v25 = vpop.f32.mrf.mxu1 }
 0x195   :  { %v222_v26 = vrot.slane %v217_v25, 2 }
 0x196   :  { %v265_v27 = vpop.f32.mrf.mxu1 }
 0x197   :  { %v224_v28 = vadd.f32 %v222_v26, %v217_v25 }
 0x199   :  { %v251_v29 = vmul.f32 -1.442695, %v224_v28 }
 0x19b   :  { %270 = vpow2.f32 %v251_v29 }
 0x1a8   :  { %v271_v30 = vpop.eup %270 }
 0x1a9   :  { %v228_v31 = vadd.f32 1.0, %v271_v30 }
 0x1ab   :  { %272 = vrcp.f32 %v228_v31 }
 0x1b8   :  { %v273_v32 = vpop.eup %272 }
 0x1b9   :  { %232 = vst.msk [vmem:[#allocation2] sm:$0x3] %vm231_vm6, %v273_v32 }
 0x1ba   :  { %285 = shalt.err (!%p282_p4)
}
 0x1bb   :  { %242 = dma.vmem_to_hbm [thread:$0]  %s240_s25, 32, %s350_s4, [#allocation3]  }
 0x1bc   :  { %294 = dma.done.wait [#allocation3], 32  }
 0x1bd   :  { %295 = vsyncadd [#allocation3], 4294967264 }
 0x1be   :  { %246 = vsyncpa [#allocation3], 1 }

</bundles_post_ra>
